<compile_context>
chip_gen: v7x
topology: tpu7x:2x2x1
jax: 0.10.0
libtpu: 0.0.40
codegen_flags: <defaults>
</compile_context>

<pallas_src>
import math

import jax
import jax.numpy as jnp
from jax.experimental import pallas as pl
from jax.experimental.pallas import tpu as pltpu


def _round_up(x: int, m: int) -> int:
    return ((x + m - 1) // m) * m


def _make_score_kernel(tn: int):
    """Kernel: gather `tn` embedding rows per grid step and score them."""

    def kernel(nodes_sm, table_hbm, w_ref, out_ref, emb_vmem, gather_sem):
        # nodes_sm:   SMEM (N_pad,) int32      (scalar prefetch)
        # table_hbm:  HBM  (num_total_nodes, D) f32 (memory_space=ANY)
        # w_ref:      VMEM (C, D) f32          (resident classifier weight)
        # out_ref:    VMEM (C, tn) f32         (lane-dense score block)
        # emb_vmem:   VMEM (2*tn, D) f32       (double-buffered gather scratch)
        # gather_sem: DMA semaphores (2,)      (one per buffer half)
        t = pl.program_id(0)
        nt = pl.num_programs(0)

        def start_gather(tile, slot):
            # One row DMA per node of `tile` into buffer half `slot`.
            @pl.loop(0, tn)
            def _(j):
                nid = nodes_sm[tile * tn + j]
                pltpu.make_async_copy(
                    table_hbm.at[nid],
                    emb_vmem.at[slot * tn + j],
                    gather_sem.at[slot],
                ).start()

        def wait_gather(slot):
            # Consume exactly tn equal-sized row-copy completions.
            @pl.loop(0, tn)
            def _(j):
                pltpu.make_async_copy(
                    table_hbm.at[0],
                    emb_vmem.at[slot * tn + j],
                    gather_sem.at[slot],
                ).wait()

        # Prime the pipeline on the first grid step.
        @pl.when(t == 0)
        def _():
            start_gather(0, 0)

        slot = t % 2

        # Wait for this tile's gathered rows.
        wait_gather(slot)

        # Prefetch the next tile's rows into the other half while we compute.
        @pl.when(t + 1 < nt)
        def _():
            start_gather(t + 1, 1 - slot)

        base = pl.multiple_of(slot * tn, tn)
        emb = emb_vmem[pl.ds(base, tn), :]  # (tn, D)

        # scores block = W @ E_tile^T with no explicit transpose:
        # contract the D axis of both operands -> (C, tn), lane-dense in N.
        out_ref[...] = jax.lax.dot_general(
            w_ref[...],
            emb,
            dimension_numbers=(((1,), (1,)), ((), ())),
            preferred_element_type=jnp.float32,
        ).astype(out_ref.dtype)

    return kernel


def supervised_graphsage_forward(
    nodes: jax.Array,
    embed_table: jax.Array,
    weight: jax.Array,
    *,
    node_tile: int | None = None,
) -> jax.Array:
    """nodes: (N,) int, embed_table: (V, D) f32, weight: (C, D) f32 -> (N, C) f32."""
    n = int(nodes.shape[0])
    v, d = embed_table.shape
    c, d2 = weight.shape
    assert d == d2
    assert embed_table.dtype == jnp.float32, "f32 table rows keep row-DMA word-aligned"

    if node_tile is None:
        # <= 2048 keeps double-buffered scratch comfortably inside v7x's 64 MiB
        # VMEM; already on the HBM roofline for v5e/v6e as well.
        node_tile = min(2048, _round_up(n, 128))
    tn = node_tile
    assert tn % 128 == 0, "node tile must be lane-aligned"

    n_pad = _round_up(n, tn)
    num_tiles = n_pad // tn

    nodes_i32 = jnp.asarray(nodes, jnp.int32)
    if n_pad != n:
        nodes_i32 = jnp.pad(nodes_i32, (0, n_pad - n))  # pad with node 0

    grid_spec = pltpu.PrefetchScalarGridSpec(
        num_scalar_prefetch=1,
        grid=(num_tiles,),
        in_specs=[
            pl.BlockSpec(memory_space=pl.ANY),                 # embedding table stays in HBM
            pl.BlockSpec((c, d), lambda t, nodes_sm: (0, 0)),  # weight resident in VMEM
        ],
        out_specs=pl.BlockSpec((c, tn), lambda t, nodes_sm: (0, t)),
        scratch_shapes=[
            pltpu.VMEM((2 * tn, d), embed_table.dtype),
            pltpu.SemaphoreType.DMA((2,)),
        ],
    )

    scores_cn = pl.pallas_call(
        _make_score_kernel(tn),
        out_shape=jax.ShapeDtypeStruct((c, n_pad), jnp.float32),
        grid_spec=grid_spec,
        compiler_params=pltpu.CompilerParams(
            # The manual gather pipeline carries DMA state (slot parity,
            # in-flight copies) across grid steps, so the node-tile axis must
            # execute sequentially.
            dimension_semantics=("arbitrary",),
            vmem_limit_bytes=32 * 1024 * 1024,
        ),
    )(nodes_i32, embed_table, weight)

    # PyTorch module returns scores.t(): (num_nodes, num_classes).
    return scores_cn[:, :n].T


def xavier_uniform(key, shape):
    # matches torch.nn.init.xavier_uniform_ for a 2-D tensor (fan_out, fan_in)
    fan_out, fan_in = shape
    bound = math.sqrt(6.0 / (fan_in + fan_out))
    return jax.random.uniform(key, shape, jnp.float32, -bound, bound)


if __name__ == "__main__":
    num_classes = 8        # label set size
    embed_dim = 128        # enc.embed_dim
    num_total_nodes = 512
    batch_nodes = 200      # not a multiple of the tile -> exercises padding

    key = jax.random.PRNGKey(0)
    k_w, k_feat, k_nodes = jax.random.split(key, 3)

    # Classifier parameter: nn.Parameter(FloatTensor(num_classes, embed_dim)),
    # xavier_uniform_ init.
    weight = xavier_uniform(k_w, (num_classes, embed_dim))

    # Stand-in for `enc(nodes)`: embedding table in row-major (V, D); the
    # per-node gather happens INSIDE the kernel via scalar-prefetched ids.
    embed_table = jax.random.normal(k_feat, (num_total_nodes, embed_dim), jnp.float32)
    nodes = jax.random.randint(k_nodes, (batch_nodes,), 0, num_total_nodes)

    # node_tile=128 -> 2 grid steps, exercising the cross-step prefetch path.
    scores = supervised_graphsage_forward(nodes, embed_table, weight, node_tile=128)
    jax.block_until_ready(scores)

    # Reference of the PyTorch math: (W @ E).T with E = embed_table[nodes].T
    emb_sel = embed_table[nodes]                              # (N, D)
    ref = jnp.einsum(
        "nd,cd->nc", emb_sel, weight, precision=jax.lax.Precision.HIGHEST
    )
    assert scores.shape == (batch_nodes, num_classes)
    assert jnp.allclose(scores, ref, atol=1e-3, rtol=1e-3), float(
        jnp.max(jnp.abs(scores - ref))
    )

    print("KERNEL_OK")
</pallas_src>

<mosaic_0001>
module attributes {stable_mosaic.version = 11 : i64} {
  func.func @kernel(%arg0: i32, %arg1: memref<256xi32, #tpu.memory_space<smem>>, %arg2: memref<512x128xf32, #tpu.memory_space<any>>, %arg3: memref<8x128xf32, #tpu.memory_space<vmem>>, %arg4: memref<8x128xf32, #tpu.memory_space<vmem>>, %arg5: memref<256x128xf32, #tpu.memory_space<vmem>>, %arg6: memref<2x!tpu.dma_semaphore, #tpu.memory_space<semaphore_mem>>) attributes {dimension_semantics = [#tpu.dimension_semantics<arbitrary>], iteration_bounds = array<i64: 2>, scalar_prefetch = 1 : i64, scratch_operands = 2 : i64, tpu.core_type = #tpu.core_type<tc>, window_params = [{}, {pipeline_mode = #tpu.pipeline_mode<synchronous>, transform_indices = @transform_1, window_bounds = array<i64: 8, 128>}, {transform_indices = @transform_2, window_bounds = array<i64: 8, 128>}]} {
    %c0_i32 = arith.constant 0 : i32
    %0 = arith.cmpi eq, %arg0, %c0_i32 : i32
    %1 = arith.extui %0 : i1 to i32
    %c0_i32_0 = arith.constant 0 : i32
    %2 = arith.cmpi ne, %1, %c0_i32_0 : i32
    scf.if %2 {
      %c0_i32_16 = arith.constant 0 : i32
      %c128_i32_17 = arith.constant 128 : i32
      %25 = arith.addi %c0_i32_16, %c128_i32_17 : i32
      %c1_i32_18 = arith.constant 1 : i32
      scf.for %arg7 = %c0_i32_16 to %25 step %c1_i32_18  : i32 {
        %c1_i32_20 = arith.constant 1 : i32
        %26 = arith.muli %arg7, %c1_i32_20 : i32
        %c0_i32_21 = arith.constant 0 : i32
        %27 = arith.addi %c0_i32_21, %26 : i32
        %c0_i32_22 = arith.constant 0 : i32
        %28 = arith.addi %c0_i32_22, %27 : i32
        %29 = arith.index_cast %28 : i32 to index
        %30 = memref.load %arg1[%29] : memref<256xi32, #tpu.memory_space<smem>>
        %c0_i32_23 = arith.constant 0 : i32
        %31 = arith.addi %c0_i32_23, %27 : i32
        %c0_i32_24 = arith.constant 0 : i32
        %c0_i32_25 = arith.constant 0 : i32
        %32 = tpu.memref_slice %arg2[%30, %c0_i32_25] : memref<512x128xf32, #tpu.memory_space<any>> -> memref<1x128xf32, #tpu.memory_space<any>>
        %33 = tpu.memref_squeeze %32 : memref<1x128xf32, #tpu.memory_space<any>> -> memref<128xf32, #tpu.memory_space<any>>
        %c0_i32_26 = arith.constant 0 : i32
        %34 = tpu.memref_slice %arg5[%31, %c0_i32_26] : memref<256x128xf32, #tpu.memory_space<vmem>> -> memref<1x128xf32, #tpu.memory_space<vmem>>
        %35 = tpu.memref_squeeze %34 : memref<1x128xf32, #tpu.memory_space<vmem>> -> memref<128xf32, #tpu.memory_space<vmem>>
        %36 = tpu.memref_slice %arg6[%c0_i32_24] : memref<2x!tpu.dma_semaphore, #tpu.memory_space<semaphore_mem>> -> memref<1x!tpu.dma_semaphore, #tpu.memory_space<semaphore_mem>>
        %37 = tpu.memref_squeeze %36 : memref<1x!tpu.dma_semaphore, #tpu.memory_space<semaphore_mem>> -> memref<!tpu.dma_semaphore, #tpu.memory_space<semaphore_mem>>
        tpu.enqueue_dma source(%33 : memref<128xf32, #tpu.memory_space<any>>) target(%35 : memref<128xf32, #tpu.memory_space<vmem>>) target_semaphore(%37 : memref<!tpu.dma_semaphore, #tpu.memory_space<semaphore_mem>>)
      }
      %c128_i32_19 = arith.constant 128 : i32
    } else {
    }
    %c2_i32 = arith.constant 2 : i32
    %c0_i32_1 = arith.constant 0 : i32
    %3 = arith.cmpi eq, %c2_i32, %c0_i32_1 : i32
    %c1_i32 = arith.constant 1 : i32
    %4 = arith.select %3, %c1_i32, %c2_i32 : i32
    %5 = arith.remsi %arg0, %4 : i32
    %c0_i32_2 = arith.constant 0 : i32
    %6 = arith.cmpi ne, %5, %c0_i32_2 : i32
    %c0_i32_3 = arith.constant 0 : i32
    %7 = arith.cmpi slt, %5, %c0_i32_3 : i32
    %c0_i32_4 = arith.constant 0 : i32
    %8 = arith.cmpi slt, %4, %c0_i32_4 : i32
    %9 = arith.xori %7, %8 : i1
    %10 = arith.andi %9, %6 : i1
    %11 = arith.addi %5, %4 : i32
    %12 = arith.select %10, %11, %5 : i32
    %c0_i32_5 = arith.constant 0 : i32
    %c128_i32 = arith.constant 128 : i32
    %13 = arith.addi %c0_i32_5, %c128_i32 : i32
    %c1_i32_6 = arith.constant 1 : i32
    scf.for %arg7 = %c0_i32_5 to %13 step %c1_i32_6  : i32 {
      %c1_i32_16 = arith.constant 1 : i32
      %25 = arith.muli %arg7, %c1_i32_16 : i32
      %c0_i32_17 = arith.constant 0 : i32
      %26 = arith.addi %c0_i32_17, %25 : i32
      %c128_i32_18 = arith.constant 128 : i32
      %27 = arith.muli %12, %c128_i32_18 : i32
      %28 = arith.addi %27, %26 : i32
      %c0_i32_19 = arith.constant 0 : i32
      %c0_i32_20 = arith.constant 0 : i32
      %29 = tpu.memref_slice %arg2[%c0_i32_19, %c0_i32_20] : memref<512x128xf32, #tpu.memory_space<any>> -> memref<1x128xf32, #tpu.memory_space<any>>
      %30 = tpu.memref_squeeze %29 : memref<1x128xf32, #tpu.memory_space<any>> -> memref<128xf32, #tpu.memory_space<any>>
      %c0_i32_21 = arith.constant 0 : i32
      %31 = tpu.memref_slice %arg5[%28, %c0_i32_21] : memref<256x128xf32, #tpu.memory_space<vmem>> -> memref<1x128xf32, #tpu.memory_space<vmem>>
      %32 = tpu.memref_squeeze %31 : memref<1x128xf32, #tpu.memory_space<vmem>> -> memref<128xf32, #tpu.memory_space<vmem>>
      %33 = tpu.memref_slice %arg6[%12] : memref<2x!tpu.dma_semaphore, #tpu.memory_space<semaphore_mem>> -> memref<1x!tpu.dma_semaphore, #tpu.memory_space<semaphore_mem>>
      %34 = tpu.memref_squeeze %33 : memref<1x!tpu.dma_semaphore, #tpu.memory_space<semaphore_mem>> -> memref<!tpu.dma_semaphore, #tpu.memory_space<semaphore_mem>>
      tpu.wait_dma2 semaphore(%34 : memref<!tpu.dma_semaphore, #tpu.memory_space<semaphore_mem>>) src(%30 : memref<128xf32, #tpu.memory_space<any>>) dst(%32 : memref<128xf32, #tpu.memory_space<vmem>>)
    }
    %c128_i32_7 = arith.constant 128 : i32
    %c1_i32_8 = arith.constant 1 : i32
    %14 = arith.addi %arg0, %c1_i32_8 : i32
    %c2_i32_9 = arith.constant 2 : i32
    %15 = arith.cmpi slt, %14, %c2_i32_9 : i32
    %16 = arith.extui %15 : i1 to i32
    %c0_i32_10 = arith.constant 0 : i32
    %17 = arith.cmpi ne, %16, %c0_i32_10 : i32
    scf.if %17 {
      %c1_i32_16 = arith.constant 1 : i32
      %25 = arith.addi %arg0, %c1_i32_16 : i32
      %c1_i32_17 = arith.constant 1 : i32
      %26 = arith.subi %c1_i32_17, %12 : i32
      %c0_i32_18 = arith.constant 0 : i32
      %c128_i32_19 = arith.constant 128 : i32
      %27 = arith.addi %c0_i32_18, %c128_i32_19 : i32
      %c1_i32_20 = arith.constant 1 : i32
      scf.for %arg7 = %c0_i32_18 to %27 step %c1_i32_20  : i32 {
        %c1_i32_22 = arith.constant 1 : i32
        %28 = arith.muli %arg7, %c1_i32_22 : i32
        %c0_i32_23 = arith.constant 0 : i32
        %29 = arith.addi %c0_i32_23, %28 : i32
        %c128_i32_24 = arith.constant 128 : i32
        %30 = arith.muli %25, %c128_i32_24 : i32
        %31 = arith.addi %30, %29 : i32
        %32 = arith.index_cast %31 : i32 to index
        %33 = memref.load %arg1[%32] : memref<256xi32, #tpu.memory_space<smem>>
        %c128_i32_25 = arith.constant 128 : i32
        %34 = arith.muli %26, %c128_i32_25 : i32
        %35 = arith.addi %34, %29 : i32
        %c0_i32_26 = arith.constant 0 : i32
        %36 = tpu.memref_slice %arg2[%33, %c0_i32_26] : memref<512x128xf32, #tpu.memory_space<any>> -> memref<1x128xf32, #tpu.memory_space<any>>
        %37 = tpu.memref_squeeze %36 : memref<1x128xf32, #tpu.memory_space<any>> -> memref<128xf32, #tpu.memory_space<any>>
        %c0_i32_27 = arith.constant 0 : i32
        %38 = tpu.memref_slice %arg5[%35, %c0_i32_27] : memref<256x128xf32, #tpu.memory_space<vmem>> -> memref<1x128xf32, #tpu.memory_space<vmem>>
        %39 = tpu.memref_squeeze %38 : memref<1x128xf32, #tpu.memory_space<vmem>> -> memref<128xf32, #tpu.memory_space<vmem>>
        %40 = tpu.memref_slice %arg6[%26] : memref<2x!tpu.dma_semaphore, #tpu.memory_space<semaphore_mem>> -> memref<1x!tpu.dma_semaphore, #tpu.memory_space<semaphore_mem>>
        %41 = tpu.memref_squeeze %40 : memref<1x!tpu.dma_semaphore, #tpu.memory_space<semaphore_mem>> -> memref<!tpu.dma_semaphore, #tpu.memory_space<semaphore_mem>>
        tpu.enqueue_dma source(%37 : memref<128xf32, #tpu.memory_space<any>>) target(%39 : memref<128xf32, #tpu.memory_space<vmem>>) target_semaphore(%41 : memref<!tpu.dma_semaphore, #tpu.memory_space<semaphore_mem>>)
      }
      %c128_i32_21 = arith.constant 128 : i32
    } else {
    }
    %c128_i32_11 = arith.constant 128 : i32
    %18 = arith.muli %12, %c128_i32_11 : i32
    %19 = tpu.assume_multiple %18, 128 : i32
    %20 = arith.index_cast %19 : i32 to index
    %c0 = arith.constant 0 : index
    %21 = vector.load %arg5[%20, %c0] : memref<256x128xf32, #tpu.memory_space<vmem>>, vector<128x128xf32>
    %c0_12 = arith.constant 0 : index
    %c0_13 = arith.constant 0 : index
    %22 = vector.load %arg3[%c0_12, %c0_13] : memref<8x128xf32, #tpu.memory_space<vmem>>, vector<8x128xf32>
    %cst = arith.constant dense<0.000000e+00> : vector<8x128xf32>
    %23 = tpu.matmul %22, %21, %cst {dimension_numbers = #tpu.dot_dimension_numbers<[1], [1], [0], [0], [0, 0, 1, 0], [], []>} : vector<8x128xf32>, vector<128x128xf32>, vector<8x128xf32> -> vector<8x128xf32>
    %c0_14 = arith.constant 0 : index
    %c0_15 = arith.constant 0 : index
    %24 = vector.load %arg4[%c0_14, %c0_15] : memref<8x128xf32, #tpu.memory_space<vmem>>, vector<8x128xf32>
    tpu.vector_store %arg4[%c0_14, %c0_15], %23 {strides = array<i32>} : memref<8x128xf32, #tpu.memory_space<vmem>>, vector<8x128xf32>,
    return
  }
  func.func @transform_1(%arg0: i32, %arg1: memref<256xi32, #tpu.memory_space<smem>>) -> (i32, i32) {
    %c0_i32 = arith.constant 0 : i32
    %c0_i32_0 = arith.constant 0 : i32
    %c0_i32_1 = arith.constant 0 : i32
    return %c0_i32, %c0_i32_0 : i32, i32
  }
  func.func @transform_2(%arg0: i32, %arg1: memref<256xi32, #tpu.memory_space<smem>>) -> (i32, i32) {
    %c0_i32 = arith.constant 0 : i32
    %c0_i32_0 = arith.constant 0 : i32
    return %c0_i32, %arg0 : i32, i32
  }
}

</mosaic_0001>

<bundles_post_ra>
// kernel: tpu_custom_call.1
= control target key start
LH: loop header
LB: loop body
LE: loop exit
PB: predicated region body
PF: predicated region fallthrough
CT: control target
= control target key end

     0   :  { %s1009_s0 = inlined_call_operand.hbm [shape: s32[256], index: 0, kind: input, shape index: {}]   ;;  %s1010_s1 = inlined_call_operand.hbm [shape: f32[512,128], index: 1, kind: input, shape index: {}]   ;;  %s1011_s2 = inlined_call_operand.hbm [shape: f32[8,128], index: 2, kind: input, shape index: {}]   ;;  %s1012_s3 = inlined_call_operand.hbm [shape: f32[8,256], index: 3, kind: output, shape index: {}]  }
   0x1   :  { %1017 = sst [smem:[#allocation21_spill]] %s1011_s2  ;;  %s573_s14 = scalar_lea.hbm %s1009_s0, 32 }
   0x2   :  { %p574_p0 = scmp.ne.s32.totalorder %s1009_s0, %s573_s14  ;;  %p577_p1 = scmp.lt.u32.totalorder %s573_s14, %s1009_s0 }
   0x4   :  { %p579_p2 = pnand %p577_p1, %p574_p0 }
   0x6   :  { %582 = shalt.err (!%p579_p2)  }
   0x7   :  { %s755_s19 = smov [#allocation5]  }
   0x8   :  { %9 = dma.hbm_to_smem %s1009_s0, 32, %s755_s19, [#allocation4] }
   0x9   :  { %715 = dma.done.wait [#allocation4], 32 }
   0xa   :  { %716 = vsyncadd [#allocation4], 4294967264 }
   0xb   :  { %11 = sfence }
   0xc   :  { %12 = vsyncpa [#allocation7], 0 }
   0xd   :  { %13 = vsyncpa [#allocation8], 0 }
   0xe   :  { %15 = vsyncpa [#allocation8 + $0x1], 0  ;;  %s795_s22 = smov 0   ;;  %s797_s23 = smov 0  }
   0xf   :  { %s799_s24 = smov 0   ;;  %s801_s25 = smov 0  }
  0x10 LB: > { %s816_s0 = sadd.s32 4294967295, %s741_s25   ;;  %s395_s26 = sadd.s32 4294967294, %s741_s25   ;;  %s741_s25 = sphi %s801_s25, %s1037_s25   ;;  %s737_s24 = sphi %s799_s24, %s1036_s24   ;;  %s733_s23 = sphi %s797_s23, %s1035_s23   ;;  %s729_s22 = sphi %s795_s22, %s1034_s22  }
  0x11   : > { %s820_s27 = sadd.s32 1, %s741_s25   ;;  %s49_s28 = sadd.s32 1, %s737_s24 }
  0x12   : > { %s46_s29 = ssub.s32 %s741_s25, %s820_s27  ;;  %p59_p3 = scmp.ne.s32.totalorder %s737_s24, %s733_s23 }
  0x13   : > { %p47_p4 = scmp.eq.s32.totalorder %s46_s29, 0  ;;  %p60_p5 = scmp.eq.s32.totalorder %s816_s0, 1 }
  0x14   : > { %p65_p6 = scmp.ne.s32.totalorder %s733_s23, %s729_s22  ;;  %p66_p7 = scmp.eq.s32.totalorder %s395_s26, 1 }
  0x15   : > { %s831_s30 = scalar_select %p47_p4, %s737_s24, %s49_s28  }
  0x16   : > { %p833_p8 = por %p60_p5, %p59_p3  ;;  %p837_p9 = por %p66_p7, %p65_p6 }
  0x17   : > { %1018 = sst [smem:[#allocation20_spill]] %s831_s30  ;;  %p396_p10 = scmp.ge.s32.totalorder %s741_s25, 1 }
  0x18   : > { %s1019_s4 = scalar_select %p833_p8, 1, 0 }
  0x19   : > { %s1020_s5 = scalar_select %p837_p9, 1, 0 }
  0x1a   : > { %p73_p11 = scmp.lt.s32.totalorder %s741_s25, 3  ;;  %p1013_p13 = scmp.eq.s32.totalorder %s816_s0, 0 }
  0x1b   : > { %s756_s7 = smov [#allocation6]   ;;  %s1023_s2 = sld [smem:[#allocation21_spill]] }
  0x1c   : > { %p845_p0 = pnand %p396_p10, %p73_p11  ;;  %s86_s8 = sshll.u32 %s756_s7, 4  ;;  %s87_s8 = int_to_ptr.vmem [resolvable:$true] %s86_s8 }
  0x1e   : > { %s1021_s6 = scalar_select %p845_p0, 1, 0 }
  0x1f   : > { %p501_p1 = pneg %p845_p0 }
  0x21   : > { %p853_p2 = pnand %p1013_p13, %p501_p1  ;;  %s583_s12 = scalar_lea.hbm %s1023_s2, 128 }
  0x22   : > { %p584_p3 = scmp.ne.s32.totalorder %s1023_s2, %s583_s12  ;;  %p590_p7 = scmp.lt.u32.totalorder %s583_s12, %s1023_s2 }
  0x23   : > { %p585_p4 = pneg %p853_p2 }
  0x25   : > { %p586_p5 = pnand %p585_p4, %p584_p3 }
  0x27   : > { %p587_p6 = pneg %p586_p5 }
  0x29   : > { %p592_p10 = pnand %p590_p7, %p587_p6 }
  0x2b   : > { %595 = shalt.err (!%p592_p10)
}
  0x2c   : > { %s596_s17 = scalar_lea.vmem %s87_s8, 128  ;;  %p604_p13 = scmp.lt.s32.totalorder %s87_s8, %s87_s8 }
  0x2d   : > { %p597_p11 = scmp.ne.s32.totalorder %s87_s8, %s596_s17  ;;  %p605_p9 = scmp.lt.s32.totalorder %s596_s17, %s596_s17 }
  0x2f   : > { %p599_p1 = pnand %p597_p11, %p585_p4  ;;  %p606_p8 = por %p605_p9, %p604_p13 }
  0x31   : > { %p600_p12 = pneg %p599_p1 }
  0x33   : > { %p607_p0 = pnand %p606_p8, %p600_p12 }
  0x35   : > { %610 = shalt.err (!%p607_p0)
}
  0x36   : > { %504 = dma.hbm_to_vmem [thread:$0]  (!%p853_p2), %s1023_s2, 128, %s87_s8, [#allocation7]  }
  0x37   : > { %p1024_p3 = scmp.ne.s32.totalorder %s1021_s6, 0 }
  0x38   : > { %p1025_p5 = scmp.eq.s32.totalorder (!%p1024_p3), %s816_s0, 0 }
  0x39   : > { %99 = sbr.rel (%p1024_p3) target bundleno = 476 (0x1dc), region = 24 }
  0x40   : > { %718 = dma.done.wait (%p1025_p5), [#allocation7], 128   ;;  %p1026_p4 = pmov %p1025_p5 }
  0x41   : > { %s1016_s20 = sand.u32 1, %s733_s23   ;;  %p1027_p8 = scmp.ne.s32.totalorder %s816_s0, 0 }
  0x42   : > { %720 = vsyncadd (%p1026_p4), [#allocation7], 4294967168  ;;  %s882_s21 = sshll.u32 %s1016_s20, 3  ;;  %s887_s28 = smov (!%p1027_p8), 0  }
  0x43   : > { %117 = sbr.rel (%p1027_p8) target bundleno = 113 (0x71), region = 32 }
  0x4a LB: >> { %s124_s29 = sld [smem:[#allocation5 + %s745_s28]]  ;;  %s127_s6 = scalar_lea.vmem [#allocation2], %s745_s28  ;;  %s745_s28 = sphi %s887_s28, %s123_s28  }
  0x4b   : >> { %s135_s7 = sshll.u32 %s127_s6, 4  ;;  %s613_s15 = scalar_lea.hbm %s1010_s1, 8192  ;;  %s136_s7 = int_to_ptr.vmem [resolvable:$true] %s135_s7 }
  0x50   : >> { %s402_s8 = sshll.u32 %s124_s29, 4 }
  0x51   : >> { %s126_s11 = scalar_lea.hbm %s1010_s1, %s402_s8 }
  0x52   : >> { %s611_s12 = scalar_lea.hbm %s126_s11, 16  ;;  %p614_p12 = scmp.lt.u32.totalorder %s126_s11, %s1010_s1 }
  0x53   : >> { %p612_p9 = scmp.ne.s32.totalorder %s126_s11, %s611_s12  ;;  %p615_p13 = scmp.lt.u32.totalorder %s613_s15, %s611_s12 }
  0x54   : >> { %p617_p2 = scmp.lt.u32.totalorder %s611_s12, %s126_s11 }
  0x55   : >> { %p616_p0 = por %p615_p13, %p614_p12 }
  0x57   : >> { %p618_p6 = por %p617_p2, %p616_p0 }
  0x59   : >> { %p619_p7 = pnand %p618_p6, %p612_p9 }
  0x5b   : >> { %622 = shalt.err (!%p619_p7)  }
  0x5c   : >> { %s623_s18 = scalar_lea.vmem %s136_s7, 16  ;;  %s757_s19 = smov [#allocation2]  }
  0x5d   : >> { %p624_p10 = scmp.ne.s32.totalorder %s136_s7, %s623_s18  ;;  %s625_s29 = sshll.u32 %s757_s19, 4  ;;  %s626_s29 = int_to_ptr.vmem [resolvable:$false] %s625_s29 }
  0x5e   : >> { %s627_s6 = scalar_lea.vmem %s626_s29, 4096  ;;  %p628_p11 = scmp.lt.s32.totalorder %s136_s7, %s626_s29 }
  0x5f   : >> { %p629_p1 = scmp.lt.s32.totalorder %s627_s6, %s623_s18 }
  0x61   : >> { %p630_p3 = por %p629_p1, %p628_p11 }
  0x63   : >> { %p631_p5 = pnand %p630_p3, %p624_p10 }
  0x65   : >> { %634 = shalt.err (!%p631_p5)  }
  0x66   : >> { %138 = dma.hbm_to_vmem [thread:$0]  %s126_s11, 16, %s136_s7, [#allocation3] }
  0x67   : >> { %s123_s28 = sadd.s32 1, %s745_s28  }
  0x68   : >> { %p120_p4 = scmp.ge.s32.totalorder %s123_s28, 128  }
  0x6a   : > { %122 = sbr.rel (!%p120_p4) target bundleno = 74 (0x4a), region = 106 }
  0x71 PF: > { %p139_p8 = scmp.lt.s32.totalorder %s816_s0, 0  ;;  %s140_s8 = ssub.s32 0, %s816_s0 }
  0x72   : > { %s403_s9 = smin.u32 %s816_s0, %s140_s8  ;;  %s747_s7 = smov 0  }
  0x73   : > { %s142_s10 = sand.u32 1, %s403_s9  }
  0x74   : > { %s143_s12 = ssub.s32 0, %s142_s10 }
  0x75   : > { %s1039_s12 = smov (!%p139_p8, %s143_s12), %s142_s10 }
  0x76   : > { %p405_p9 = scmp.lt.s32.totalorder %s1039_s12, 0  ;;  %s149_s13 = sadd.s32 2, %s1039_s12 }
  0x78   : > { %s1041_s13 = smov (!%p405_p9, %s149_s13), %s1039_s12 }
  0x79 LB: >> { %s157_s28 = scalar_lea.sflag [#allocation3], %s1041_s13  ;;  %s749_s7 = sphi %s747_s7, %s156_s7  }
  0x7a   : >> { %721 = dma.done.wait %s157_s28, 16 }
  0x7b   : >> { %722 = vsyncadd %s157_s28, 4294967280  ;;  %s156_s7 = sadd.s32 1, %s749_s7  }
  0x7c   : >> { %p153_p12 = scmp.ge.s32.totalorder %s156_s7, 128  }
  0x7d   : > { %s160_s11 = sadd.s32 (%p153_p12), 1, %s816_s0 }
  0x7e   : > { %155 = sbr.rel (!%p153_p12) target bundleno = 121 (0x79), region = 117  ;;  %p406_p13 = scmp.ge.s32.totalorder (%p153_p12), %s160_s11, 2 }
  0x85   : > { %164 = sbr.rel (%p406_p13) target bundleno = 182 (0xb6), region = 54  ;;  %s165_s14 = ssub.s32 (!%p406_p13), 1, %s1041_s13 }
  0x86   : > { %s914_s15 = smov (!%p406_p13), 0  }
  0x8c LB: >> { %s417_s16 = sshll.u32 %s816_s0, 7  ;;  %s408_s19 = sshll.u32 %s165_s14, 7  ;;  %s753_s15 = sphi %s914_s15, %s171_s15  }
  0x8d   : >> { %s418_s17 = sadd.s32 128, %s417_s16  ;;  %s176_s6 = sadd.s32 %s753_s15, %s408_s19 }
  0x8e   : >> { %s173_s18 = sadd.s32 %s753_s15, %s418_s17  ;;  %s179_s8 = scalar_lea.vmem [#allocation2], %s176_s6 }
  0x8f   : >> { %s174_s29 = sld [smem:[#allocation5 + %s173_s18]]  ;;  %s188_s9 = sshll.u32 %s179_s8, 4  ;;  %s189_s9 = int_to_ptr.vmem [resolvable:$true] %s188_s9 }
  0x90   : >> { %s180_s11 = scalar_lea.sflag [#allocation3], %s165_s14  ;;  %s637_s16 = scalar_lea.hbm %s1010_s1, 8192 }
  0x95   : >> { %s409_s10 = sshll.u32 %s174_s29, 4 }
  0x96   : >> { %s178_s28 = scalar_lea.hbm %s1010_s1, %s409_s10 }
  0x97   : >> { %s635_s20 = scalar_lea.hbm %s178_s28, 16  ;;  %p638_p2 = scmp.lt.u32.totalorder %s178_s28, %s1010_s1 }
  0x98   : >> { %p636_p0 = scmp.ne.s32.totalorder %s178_s28, %s635_s20  ;;  %p639_p6 = scmp.lt.u32.totalorder %s637_s16, %s635_s20 }
  0x99   : >> { %p641_p10 = scmp.lt.u32.totalorder %s635_s20, %s178_s28 }
  0x9a   : >> { %p640_p7 = por %p639_p6, %p638_p2 }
  0x9c   : >> { %p642_p11 = por %p641_p10, %p640_p7 }
  0x9e   : >> { %p643_p1 = pnand %p642_p11, %p636_p0 }
  0xa0   : >> { %646 = shalt.err (!%p643_p1)  }
  0xa1   : >> { %s647_s18 = scalar_lea.vmem %s189_s9, 16  ;;  %s758_s19 = smov [#allocation2]  }
  0xa2   : >> { %p648_p3 = scmp.ne.s32.totalorder %s189_s9, %s647_s18  ;;  %s649_s29 = sshll.u32 %s758_s19, 4  ;;  %s650_s29 = int_to_ptr.vmem [resolvable:$false] %s649_s29 }
  0xa3   : >> { %s651_s6 = scalar_lea.vmem %s650_s29, 4096  ;;  %p652_p5 = scmp.lt.s32.totalorder %s189_s9, %s650_s29 }
  0xa4   : >> { %p653_p4 = scmp.lt.s32.totalorder %s651_s6, %s647_s18 }
  0xa6   : >> { %p654_p8 = por %p653_p4, %p652_p5 }
  0xa8   : >> { %p655_p9 = pnand %p654_p8, %p648_p3 }
  0xaa   : >> { %658 = shalt.err (!%p655_p9)  }
  0xab   : >> { %191 = dma.hbm_to_vmem [thread:$0]  %s178_s28, 16, %s189_s9, %s180_s11 }
  0xac   : >> { %s171_s15 = sadd.s32 1, %s753_s15  }
  0xad   : >> { %p168_p12 = scmp.ge.s32.totalorder %s171_s15, 128  }
  0xaf   : > { %170 = sbr.rel (!%p168_p12) target bundleno = 140 (0x8c), region = 128 }
  0xb6 PF: > { %s410_s2 = sshll.u32 %s1041_s13, 7  ;;  %v759_v0 = vmov 0.0|0.0   ;;  %vm760_vm0 = vmmov 0   ;;  %v761_v1 = vmov 0.0   ;;  %v210_v26 = vld [vmem:[#allocation6] sm:$0xff]  ;;  %s412_s20 = sshll.u32 %s816_s0, 7 }
  0xb7   : > { %471 = vmatprep.subr.bf16.mxu0 %v759_v0  ;;  %468 = vmatprep.mubr.msk.f32.mxu0 %vm760_vm0, %v761_v1  ;;  %s939_s30 = scalar_lea.vmem [#allocation2], %s410_s2  ;;  %s1028_s26 = scalar_lea.vmem [#allocation9], %s882_s21 }
  0xb8   : > { %v194_v2 = vld [vmem:[%s939_s30] sm:$0xff]  ;;  %v195_v3 = vld [vmem:[%s939_s30 + $0x8] sm:$0xff]  ;;  %v196_v5 = vld [vmem:[%s939_s30 + $0x10] sm:$0xff]  ;;  %s296_s13 = sshll.u32 %s1028_s26, 4  ;;  %s963_s8 = scalar_lea.hbm %s1012_s3, %s412_s20  ;;  %s965_s13 = int_to_ptr.vmem [resolvable:$true] %s296_s13 }
  0xb9   : > { %v472_v4 = vpack.c.bf16 %v195_v3, %v194_v2  ;;  %v197_v6 = vld [vmem:[%s939_s30 + $0x18] sm:$0xff]  ;;  %v198_v8 = vld [vmem:[%s939_s30 + $0x20] sm:$0xff]  ;;  %v199_v9 = vld [vmem:[%s939_s30 + $0x28] sm:$0xff]  ;;  %s1029_s9 = smov %s1028_s26  ;;  %s1030_s10 = sand.u32 1, %s733_s23  }
  0xba   : > { %v475_v7 = vpack.c.bf16 %v197_v6, %v196_v5  ;;  %v478_v10 = vpack.c.bf16 %v199_v9, %v198_v8  ;;  %v200_v11 = vld [vmem:[%s939_s30 + $0x30] sm:$0xff]  ;;  %v201_v12 = vld [vmem:[%s939_s30 + $0x38] sm:$0xff]  ;;  %v202_v14 = vld [vmem:[%s939_s30 + $0x40] sm:$0xff]  ;;  %s283_s12 = scalar_lea.sflag [#allocation8], %s1030_s10  ;;  %s659_s7 = scalar_lea.vmem %s965_s13, 128 }
  0xbb   : > { %473 = vmatpush3.bf16.xpose.msra.mxu0 %v472_v4  ;;  %v481_v13 = vpack.c.bf16 %v201_v12, %v200_v11  ;;  %v203_v15 = vld [vmem:[%s939_s30 + $0x48] sm:$0xff]  ;;  %v204_v17 = vld [vmem:[%s939_s30 + $0x50] sm:$0xff]  ;;  %v205_v18 = vld [vmem:[%s939_s30 + $0x58] sm:$0xff]  ;;  %p660_p13 = scmp.ne.s32.totalorder %s965_s13, %s659_s7  ;;  %p1031_p0 = scmp.ne.s32.totalorder %s1019_s4, 0 }
  0xbc   : > { %474 = vmatprep.subr.bf16.mxu0 %v759_v0  ;;  %v484_v16 = vpack.c.bf16 %v203_v15, %v202_v14  ;;  %v487_v19 = vpack.c.bf16 %v205_v18, %v204_v17  ;;  %v206_v20 = vld [vmem:[%s939_s30 + $0x60] sm:$0xff]  ;;  %v207_v21 = vld [vmem:[%s939_s30 + $0x68] sm:$0xff]  ;;  %v208_v23 = vld [vmem:[%s939_s30 + $0x70] sm:$0xff]  ;;  %s762_s0 = smov [#allocation9]  }
  0xbd   : > { %v490_v22 = vpack.c.bf16 %v207_v21, %v206_v20  ;;  %v209_v24 = vld [vmem:[%s939_s30 + $0x78] sm:$0xff]  ;;  %p661_p2 = pnand %p660_p13, %p1031_p0  ;;  %s663_s28 = sshll.u32 %s762_s0, 4  ;;  %s664_s28 = int_to_ptr.vmem [resolvable:$false] %s663_s28 }
  0xbe   : > { %v493_v25 = vpack.c.bf16 %v209_v24, %v208_v23  ;;  %s665_s11 = scalar_lea.vmem %s664_s28, 256  ;;  %p666_p7 = scmp.lt.s32.totalorder %s965_s13, %s664_s28 }
  0xbf   : > { %p662_p6 = pneg %p661_p2  ;;  %p667_p10 = scmp.lt.s32.totalorder %s665_s11, %s659_s7 }
  0xc1   : > { %p668_p11 = por %p667_p10, %p666_p7 }
  0xc3   : > { %476 = vmatpush3.bf16.xpose.msra.mxu0 %v475_v7  ;;  %p669_p1 = pnand %p668_p11, %p662_p6 }
  0xc4   : > { %477 = vmatprep.subr.bf16.mxu0 %v759_v0 }
  0xcb   : > { %479 = vmatpush3.bf16.xpose.msra.mxu0 %v478_v10 }
  0xcc   : > { %480 = vmatprep.subr.bf16.mxu0 %v759_v0 }
  0xd3   : > { %482 = vmatpush3.bf16.xpose.msra.mxu0 %v481_v13 }
  0xd4   : > { %483 = vmatprep.subr.bf16.mxu0 %v759_v0 }
  0xdb   : > { %485 = vmatpush3.bf16.xpose.msra.mxu0 %v484_v16 }
  0xdc   : > { %486 = vmatprep.subr.bf16.mxu0 %v759_v0 }
  0xe3   : > { %488 = vmatpush3.bf16.xpose.msra.mxu0 %v487_v19 }
  0xe4   : > { %489 = vmatprep.subr.bf16.mxu0 %v759_v0 }
  0xeb   : > { %491 = vmatpush3.bf16.xpose.msra.mxu0 %v490_v22 }
  0xec   : > { %492 = vmatprep.subr.bf16.mxu0 %v759_v0 }
  0xf3   : > { %494 = vmatpush3.bf16.xpose.msra.mxu0 %v493_v25 }
  0xfa   : > { %469 = vmatmul.mubr.f32.vlgmr.msra.gmra.mrb[0].mxu0 %v210_v26 }
 0x1cd   : > { %v277_v27 = vpop.f32.mrb[0].mxu0 }
 0x1ce   : > { %281 = vst [vmem:[%s1029_s9] sm:$0xff] %v277_v27  ;;  %v470_v28 = vpop.f32.mrb[1].mxu0 }
 0x1cf   : > { %672 = shalt.err (!%p669_p1)
}
 0x1d0   : > { %s673_s21 = scalar_lea.hbm %s963_s8, 128  ;;  %s677_s18 = scalar_lea.hbm %s1012_s3, 256 }
 0x1d1   : > { %p674_p3 = scmp.ne.s32.totalorder %s963_s8, %s673_s21  ;;  %p678_p8 = scmp.lt.u32.totalorder %s963_s8, %s1012_s3 }
 0x1d2   : > { %p679_p9 = scmp.lt.u32.totalorder %s677_s18, %s673_s21  ;;  %p681_p13 = scmp.lt.u32.totalorder %s673_s21, %s963_s8 }
 0x1d3   : > { %p675_p5 = pnand %p674_p3, %p1031_p0 }
 0x1d4   : > { %p680_p12 = por %p679_p9, %p678_p8 }
 0x1d5   : > { %p676_p4 = pneg %p675_p5 }
 0x1d6   : > { %p682_p2 = por %p681_p13, %p680_p12 }
 0x1d8   : > { %p683_p6 = pnand %p682_p2, %p676_p4 }
 0x1da   : > { %686 = shalt.err (!%p683_p6)
}
 0x1db   : > { %499 = dma.vmem_to_hbm [thread:$0]  (%p1031_p0), %s965_s13, 128, %s963_s8, %s283_s12  }
 0x1dc PF: > { %p511_p7 = scmp.ge.s32.totalorder %s741_s25, 2  ;;  %s308_s6 = sand.u32 1, %s729_s22  }
 0x1dd   : > { %p1032_p10 = scmp.ne.s32.totalorder %s1020_s5, 0  ;;  %s309_s2 = scalar_lea.sflag [#allocation8], %s308_s6 }
 0x1df   : > { %p506_p11 = pnand %p511_p7, %p1032_p10 }
 0x1e1   : > { %724 = dma.done.wait (!%p506_p11), %s309_s2, 128  }
 0x1e2   : > { %726 = vsyncadd (!%p506_p11), %s309_s2, 4294967168  ;;  %s1033_s30 = sld [smem:[#allocation20_spill]]  ;;  %p18_p1 = scmp.ge.s32.totalorder %s820_s27, 4  }
 0x1e3   : > { %s1034_s22 = smov %s733_s23  ;;  %s1035_s23 = smov %s737_s24 }
 0x1e4   : > { %s1037_s25 = smov %s820_s27  ;;  %20 = sbr.rel (!%p18_p1) target bundleno = 16 (0x10), region = 139 }
 0x1e8   : > { %s1036_s24 = smov %s1033_s30 }
 0x1eb   :  { %314 = vsyncpa [#allocation7], 1 }
 0x1ec   :  { %316 = vsyncpa [#allocation7 + $0x1], 1 }
 0x1ed   :  { %317 = vsyncpa [#allocation8], 1 }
 0x1ee   :  { %319 = vsyncpa [#allocation8 + $0x1], 1 }
 0x1ef   :  { %320 = vsyncmov [#allocation3] }
 0x1f2   :  { %s321_s25 = vpop.sfrf %320 }
 0x1f3   :  { %p415_p0 = scmp.ne.s32.totalorder %s321_s25, 0 }
 0x1f5   :  { %325 = shalt.err (%p415_p0)  }
 0x1f6   :  { %327 = vsyncmov [#allocation3 + $0x1] }
 0x1f9   :  { %s328_s4 = vpop.sfrf %327 }
 0x1fa   :  { %p416_p3 = scmp.ne.s32.totalorder %s328_s4, 0 }
 0x1fc   :  { %332 = shalt.err (%p416_p3)  }

</bundles_post_ra>
